<compile_context>
chip_gen: v7x
topology: tpu7x:2x2x1
jax: 0.10.0
libtpu: 0.0.40
codegen_flags: <defaults>
</compile_context>

<pallas_src>
import functools

import jax
import jax.numpy as jnp
from jax import lax
from jax.experimental import pallas as pl
from jax.experimental.pallas import tpu as pltpu


def _gated_kernel(a_ref, b_ref, o_ref, *, chunk, n_chunks, mm_dtype):
    """a_ref, b_ref, o_ref: (1, TB, H, W) VMEM tiles, TB == chunk * n_chunks."""

    def compute(start):
        a = jnp.tanh(a_ref[0, pl.ds(start, chunk)].astype(jnp.float32))
        b_raw = b_ref[0, pl.ds(start, chunk)].astype(jnp.float32)
        # sigmoid(x) == 0.5 * (tanh(0.5 * x) + 1): single EUP op per element.
        b = 0.5 * (jnp.tanh(0.5 * b_raw) + 1.0)
        o = jnp.einsum(
            "cij,cjk->cik",
            a.astype(mm_dtype),
            b.astype(mm_dtype),
            preferred_element_type=jnp.float32,
        )
        o_ref[0, pl.ds(start, chunk)] = o.astype(o_ref.dtype)

    if n_chunks == 1:
        compute(0)
    else:
        def body(i, carry):
            compute(pl.multiple_of(i * chunk, chunk))
            return carry

        lax.fori_loop(0, n_chunks, body, 0)


def _round_up(x, m):
    return ((x + m - 1) // m) * m


def _padded_vmem_bytes(h, w, itemsize):
    """VMEM footprint of one (h, w) matrix: lanes pad to 128, sublanes to 8/16/32."""
    sublane = 8 * max(1, 4 // itemsize)
    return _round_up(h, sublane) * _round_up(w, 128) * itemsize


def _physical_vmem_bytes():
    try:
        info = pltpu.get_tpu_info()
        for attr in ("vmem_capacity_bytes", "vmem_bytes"):
            val = getattr(info, attr, None)
            if val:
                return int(val)
    except Exception:
        pass
    return 64 << 20  # conservative default: v7x per-TensorCore VMEM


def _largest_divisor_at_most(n, cap):
    cap = max(1, min(cap, n))
    for d in range(cap, 0, -1):
        if n % d == 0:
            return d
    return 1


def gated_activation(x, *, chunk_channels=8):
    """x: (N, C, H, W) with C even and H == W. Returns (N, C//2, H, W)."""
    N, C, H, W = x.shape
    assert C % 2 == 0, "channel dim must be even"
    assert H == W, "matmul(a, b) of equal-shaped chunks requires H == W"
    half = C // 2

    itemsize = jnp.dtype(x.dtype).itemsize
    in_mat = _padded_vmem_bytes(H, W, itemsize)    # one (H, W) input matrix in VMEM
    out_mat = _padded_vmem_bytes(H, W, itemsize)
    f32_mat = _padded_vmem_bytes(H, W, 4)

    # Generation-aware budget: ~75% of physical VMEM (v7x: 64 MiB/TC -> ~48 MiB,
    # v5e/v6e: 128 MiB -> ~96 MiB); the tile heuristic targets 85% of that to
    # leave headroom for compiler scratch.
    phys_vmem = _physical_vmem_bytes()
    vmem_limit = int(phys_vmem * 0.75)
    tile_budget = int(vmem_limit * 0.85)

    chunk_target = max(1, min(chunk_channels, half))
    # Per grid step: (a + b + out) blocks, each double-buffered by the pipeline,
    # plus ~4 chunk-sized f32 temporaries (tanh(a), sigmoid(b), f32 acc, cast).
    fixed_bytes = 4 * chunk_target * f32_mat
    per_channel = 2 * (2 * in_mat + out_mat)
    tb = max(1, (tile_budget - fixed_bytes) // per_channel)
    tb = int(min(tb, half))
    if tb >= 8:
        tb = (tb // 8) * 8  # keep the in-kernel chunk loop remainder-free

    # v7x has 2 TensorCores per chip: ensure megacore has >= 2 blocks to shard.
    if N * pl.cdiv(half, tb) < 2 and half >= 2:
        tb = pl.cdiv(half, 2)

    chunk = _largest_divisor_at_most(tb, chunk_target)
    n_chunks = tb // chunk
    c_blocks = pl.cdiv(half, tb)

    # bf16-native MXU on all supported generations; f32 inputs stay f32.
    mm_dtype = jnp.bfloat16 if x.dtype == jnp.bfloat16 else jnp.float32

    # Free (bitcast) view: row 2n of dim 0 is the `a` half of batch n,
    # row 2n + 1 is the `b` half. No extra HBM pass, and the channel axis can
    # be tiled raggedly (Pallas masks the boundary block's writeback).
    xr = x.reshape(2 * N, half, H, W)

    kernel = functools.partial(
        _gated_kernel, chunk=chunk, n_chunks=n_chunks, mm_dtype=mm_dtype
    )

    return pl.pallas_call(
        kernel,
        out_shape=jax.ShapeDtypeStruct((N, half, H, W), x.dtype),
        grid_spec=pltpu.PrefetchScalarGridSpec(
            num_scalar_prefetch=0,
            grid=(N, c_blocks),
            in_specs=[
                # a half: row 2n of the reshaped view, channel block c.
                pl.BlockSpec((1, tb, H, W), lambda n, c: (2 * n, c, 0, 0)),
                # b half: row 2n + 1 of the reshaped view, channel block c.
                pl.BlockSpec((1, tb, H, W), lambda n, c: (2 * n + 1, c, 0, 0)),
            ],
            out_specs=pl.BlockSpec((1, tb, H, W), lambda n, c: (n, c, 0, 0)),
        ),
        compiler_params=pltpu.CompilerParams(
            dimension_semantics=("parallel", "parallel"),
            vmem_limit_bytes=vmem_limit,
        ),
    )(xr, xr)


def _reference(x):
    half = x.shape[1] // 2
    a = jnp.tanh(x[:, :half].astype(jnp.float32))
    b = jax.nn.sigmoid(x[:, half:].astype(jnp.float32))
    return jnp.matmul(a, b).astype(x.dtype)


if __name__ == "__main__":
    key = jax.random.PRNGKey(0)
    # N=2, C=4 (two gated channels), spatial 16x16 (square, as matmul requires).
    x = jax.random.normal(key, (2, 4, 16, 16), dtype=jnp.float32)

    out = gated_activation(x)
    jax.block_until_ready(out)

    ref = _reference(x)
    assert out.shape == (2, 2, 16, 16)
    assert jnp.allclose(out, ref, atol=1e-5, rtol=1e-5), "mismatch vs reference"

    print("KERNEL_OK")
</pallas_src>

<mosaic_0001>
module attributes {stable_mosaic.version = 11 : i64} {
  func.func @_gated_kernel(%arg0: i32, %arg1: i32, %arg2: memref<1x2x16x16xf32, #tpu.memory_space<vmem>>, %arg3: memref<1x2x16x16xf32, #tpu.memory_space<vmem>>, %arg4: memref<1x2x16x16xf32, #tpu.memory_space<vmem>>) attributes {dimension_semantics = [#tpu.dimension_semantics<parallel>, #tpu.dimension_semantics<parallel>], iteration_bounds = array<i64: 2, 1>, scalar_prefetch = 0 : i64, scratch_operands = 0 : i64, tpu.core_type = #tpu.core_type<tc>, window_params = [{transform_indices = @transform_0, window_bounds = array<i64: 1, 2, 16, 16>}, {transform_indices = @transform_1, window_bounds = array<i64: 1, 2, 16, 16>}, {transform_indices = @transform_2, window_bounds = array<i64: 1, 2, 16, 16>}]} {
    %c0 = arith.constant 0 : index
    %c0_0 = arith.constant 0 : index
    %c0_1 = arith.constant 0 : index
    %c0_2 = arith.constant 0 : index
    %0 = vector.load %arg2[%c0, %c0_0, %c0_1, %c0_2] : memref<1x2x16x16xf32, #tpu.memory_space<vmem>>, vector<1x2x16x16xf32>
    %1 = vector.shape_cast %0 : vector<1x2x16x16xf32> to vector<2x16x16xf32>
    %2 = math.tanh %1 : vector<2x16x16xf32>
    %c0_3 = arith.constant 0 : index
    %c0_4 = arith.constant 0 : index
    %c0_5 = arith.constant 0 : index
    %c0_6 = arith.constant 0 : index
    %3 = vector.load %arg3[%c0_3, %c0_4, %c0_5, %c0_6] : memref<1x2x16x16xf32, #tpu.memory_space<vmem>>, vector<1x2x16x16xf32>
    %4 = vector.shape_cast %3 : vector<1x2x16x16xf32> to vector<2x16x16xf32>
    %cst = arith.constant 5.000000e-01 : f32
    %5 = vector.broadcast %cst : f32 to vector<2x16x16xf32>
    %6 = arith.mulf %5, %4 : vector<2x16x16xf32>
    %7 = math.tanh %6 : vector<2x16x16xf32>
    %cst_7 = arith.constant 1.000000e+00 : f32
    %8 = vector.broadcast %cst_7 : f32 to vector<2x16x16xf32>
    %9 = arith.addf %7, %8 : vector<2x16x16xf32>
    %cst_8 = arith.constant 5.000000e-01 : f32
    %10 = vector.broadcast %cst_8 : f32 to vector<2x16x16xf32>
    %11 = arith.mulf %10, %9 : vector<2x16x16xf32>
    "tpu.trace_start"() <{level = 10 : i32, message = "cij,cjk->cik"}> : () -> ()
    %cst_9 = arith.constant dense<0.000000e+00> : vector<2x16x16xf32>
    %12 = tpu.matmul %2, %11, %cst_9 {dimension_numbers = #tpu.dot_dimension_numbers<[2], [1], [1], [2], [0, 0, 0, 1, 1, 2], [0], [0]>} : vector<2x16x16xf32>, vector<2x16x16xf32>, vector<2x16x16xf32> -> vector<2x16x16xf32>
    "tpu.trace_stop"() : () -> ()
    %c0_10 = arith.constant 0 : index
    %c0_11 = arith.constant 0 : index
    %c0_12 = arith.constant 0 : index
    %c0_13 = arith.constant 0 : index
    %13 = vector.load %arg4[%c0_10, %c0_11, %c0_12, %c0_13] : memref<1x2x16x16xf32, #tpu.memory_space<vmem>>, vector<1x2x16x16xf32>
    %14 = vector.shape_cast %13 : vector<1x2x16x16xf32> to vector<2x16x16xf32>
    %15 = vector.shape_cast %12 : vector<2x16x16xf32> to vector<1x2x16x16xf32>
    tpu.vector_store %arg4[%c0_10, %c0_11, %c0_12, %c0_13], %15 {strides = array<i32>} : memref<1x2x16x16xf32, #tpu.memory_space<vmem>>, vector<1x2x16x16xf32>,
    return
  }
  func.func @transform_0(%arg0: i32, %arg1: i32) -> (i32, i32, i32, i32) {
    %c2_i32 = arith.constant 2 : i32
    %0 = arith.muli %c2_i32, %arg0 : i32
    %c0_i32 = arith.constant 0 : i32
    %c0_i32_0 = arith.constant 0 : i32
    %c0_i32_1 = arith.constant 0 : i32
    return %0, %arg1, %c0_i32, %c0_i32_0 : i32, i32, i32, i32
  }
  func.func @transform_1(%arg0: i32, %arg1: i32) -> (i32, i32, i32, i32) {
    %c2_i32 = arith.constant 2 : i32
    %0 = arith.muli %c2_i32, %arg0 : i32
    %c1_i32 = arith.constant 1 : i32
    %1 = arith.addi %0, %c1_i32 : i32
    %c0_i32 = arith.constant 0 : i32
    %c0_i32_0 = arith.constant 0 : i32
    %c0_i32_1 = arith.constant 0 : i32
    return %1, %arg1, %c0_i32, %c0_i32_0 : i32, i32, i32, i32
  }
  func.func @transform_2(%arg0: i32, %arg1: i32) -> (i32, i32, i32, i32) {
    %c0_i32 = arith.constant 0 : i32
    %c0_i32_0 = arith.constant 0 : i32
    %c0_i32_1 = arith.constant 0 : i32
    return %arg0, %arg1, %c0_i32, %c0_i32_0 : i32, i32, i32, i32
  }
}

</mosaic_0001>

<bundles_post_ra>
// kernel: tpu_custom_call.1
= control target key start
LH: loop header
LB: loop body
LE: loop exit
PB: predicated region body
PF: predicated region fallthrough
CT: control target
= control target key end

     0   :  { %s1313_s0 = inlined_call_operand.hbm [shape: f32[4,2,16,16], index: 0, kind: input, shape index: {}]   ;;  %s1314_s1 = inlined_call_operand.hbm [shape: f32[4,2,16,16], index: 1, kind: input, shape index: {}]   ;;  %s1315_s2 = inlined_call_operand.hbm [shape: f32[2,2,16,16], index: 2, kind: output, shape index: {}]  }
   0x1   :  { %1326 = sst [smem:[#allocation14_spill]] %s1313_s0 }
   0x2   :  { %7 = vsyncpa [#allocation3], 0 }
   0x3   :  { %9 = vsyncpa [#allocation3 + $0x1], 0 }
   0x4   :  { %10 = vsyncpa [#allocation6], 0 }
   0x5   :  { %12 = vsyncpa [#allocation6 + $0x1], 0 }
   0x6   :  { %13 = vsyncpa [#allocation4], 0 }
   0x7   :  { %15 = vsyncpa [#allocation4 + $0x1], 0  ;;  %s986_s9 = smov 0   ;;  %s988_s10 = smov 0  }
   0x8   :  { %s990_s11 = smov 0   ;;  %s992_s12 = smov 0  }
   0x9   :  { %s994_s13 = smov 0   ;;  %s996_s14 = smov 0  }
   0xa   :  { %s998_s15 = smov 0   ;;  %s1000_s16 = smov 0  }
   0xb   :  { %s1002_s17 = smov 0   ;;  %s1004_s18 = smov 0  }
   0xc   :  { %s1006_s19 = smov 0   ;;  %s1008_s20 = smov 0  }
   0xd LB: > { %1327 = sst [smem:[#allocation11_spill]] %s950_s17  ;;  %s568_s21 = sadd.s32 4294967295, %s962_s20   ;;  %s962_s20 = sphi %s1008_s20, %s21_s20   ;;  %s958_s19 = sphi %s1006_s19, %s1363_s19   ;;  %s954_s18 = sphi %s1004_s18, %s1362_s18   ;;  %s950_s17 = sphi %s1002_s17, %s1352_s17   ;;  %s946_s16 = sphi %s1000_s16, %s1361_s16   ;;  %s942_s15 = sphi %s998_s15, %s1360_s15   ;;  %s938_s14 = sphi %s996_s14, %s1359_s14   ;;  %s934_s13 = sphi %s994_s13, %s1358_s13   ;;  %s930_s12 = sphi %s992_s12, %s1357_s12   ;;  %s926_s11 = sphi %s990_s11, %s1356_s11   ;;  %s922_s10 = sphi %s988_s10, %s1355_s10   ;;  %s918_s9 = sphi %s986_s9, %s1354_s9  }
   0xe   : > { %s569_s22 = sadd.s32 4294967294, %s962_s20   ;;  %s33_s23 = sadd.s32 1, %s958_s19 }
   0xf   : > { %s570_s24 = sshll.u32 %s958_s19, 1  ;;  %p35_p0 = scmp.ge.s32.totalorder %s33_s23, 2 }
  0x10   : > { %s44_s25 = sadd.s32 1, %s950_s17  ;;  %p51_p1 = scmp.ne.s32.totalorder %s950_s17, %s946_s16 }
  0x11   : > { %p1319_p2 = scmp.eq.s32.totalorder %s962_s20, 0  ;;  %s1365_s23 = smov (%p35_p0, %s33_s23), 0 }
  0x12   : > { %1328 = sst [smem:[#allocation12_spill]] %s1365_s23  ;;  %p57_p4 = scmp.ne.s32.totalorder %s946_s16, %s942_s15 }
  0x13   : > { %p1056_p3 = por %p1319_p2, %p51_p1  ;;  %s571_s27 = sshll.u32 %s1365_s23, 1 }
  0x14   : > { %p1062_p5 = scmp.eq.s32.totalorder %s568_s21, 0  ;;  %s39_s29 = ssub.s32 %s570_s24, %s571_s27 }
  0x15   : > { %s68_s30 = sadd.s32 1, %s570_s24  ;;  %p42_p6 = scmp.eq.s32.totalorder %s39_s29, 0 }
  0x16   : > { %s1330_s28 = scalar_select %p1062_p5, 1, 0 }
  0x17   : > { %p1068_p7 = por %p1062_p5, %p57_p4  ;;  %s70_s4 = sadd.s32 1, %s571_s27 }
  0x18   : > { %s99_s5 = ssub.s32 %s958_s19, %s1365_s23  ;;  %s71_s7 = ssub.s32 %s68_s30, %s70_s4 }
  0x19   : > { %s1331_s3 = scalar_select %p1068_p7, 1, 0 }
  0x1a   : > { %s1075_s6 = scalar_select %p42_p6, %s950_s17, %s44_s25  }
  0x1b   : > { %p102_p8 = scmp.eq.s32.totalorder %s99_s5, 0  ;;  %p1077_p9 = scmp.eq.s32.totalorder %s71_s7, 0 }
  0x1c   : > { %1332 = sst [smem:[#allocation13_spill]] %s1075_s6  ;;  %s104_s15 = sadd.s32 1, %s926_s11 }
  0x1d   : > { %s1083_s24 = scalar_select %p102_p8, %s926_s11, %s104_s15  }
  0x1e   : > { %p114_p10 = scmp.ne.s32.totalorder %s926_s11, %s922_s10  ;;  %p115_p11 = scmp.eq.s32.totalorder %s568_s21, 1 }
  0x1f   : > { %p120_p12 = scmp.ne.s32.totalorder %s922_s10, %s918_s9  ;;  %p121_p13 = scmp.eq.s32.totalorder %s569_s22, 1 }
  0x20   : > { %p1089_p0 = por %p115_p11, %p114_p10  ;;  %p1318_p6 = scmp.lt.s32.totalorder %s962_s20, 2 }
  0x21   : > { %p1094_p4 = por %p121_p13, %p120_p12  ;;  %s141_s29 = sand.u32 1, %s950_s17  }
  0x22   : > { %s1334_s27 = scalar_select %p1089_p0, 1, 0 }
  0x23   : > { %s1335_s25 = scalar_select %p1094_p4, 1, 0 }
  0x24   : > { %s1317_s30 = sshll.u32 %s958_s19, 10  ;;  %s576_s4 = sshll.u32 %s141_s29, 5 }
  0x25   : > { %s1336_s0 = sld [smem:[#allocation14_spill]]  ;;  %s145_s22 = scalar_lea.vmem [#allocation2], %s576_s4 }
  0x26   : > { %s156_s15 = sshll.u32 %s145_s22, 4  ;;  %p1112_p8 = pnand %p1318_p6, %p1056_p3  ;;  %s1116_s15 = int_to_ptr.vmem [resolvable:$true] %s156_s15 }
  0x27   : > { %s1118_s6 = scalar_lea.sflag [#allocation3], %s141_s29 }
  0x28   : > { %p769_p11 = pneg %p1112_p8 }
  0x2b   : > { %s1106_s21 = scalar_lea.hbm %s1336_s0, %s1317_s30  ;;  %s772_s7 = scalar_lea.hbm %s1336_s0, 2048 }
  0x2c   : > { %s767_s5 = scalar_lea.hbm %s1106_s21, 512  ;;  %p773_p3 = scmp.lt.u32.totalorder %s1106_s21, %s1336_s0 }
  0x2d   : > { %p768_p10 = scmp.ne.s32.totalorder %s1106_s21, %s767_s5  ;;  %p774_p1 = scmp.lt.u32.totalorder %s772_s7, %s767_s5 }
  0x2e   : > { %p776_p2 = scmp.lt.u32.totalorder %s767_s5, %s1106_s21 }
  0x2f   : > { %p770_p12 = pnand %p769_p11, %p768_p10  ;;  %p775_p6 = por %p774_p1, %p773_p3 }
  0x31   : > { %p771_p13 = pneg %p770_p12  ;;  %p777_p4 = por %p776_p2, %p775_p6 }
  0x33   : > { %p778_p0 = pnand %p777_p4, %p771_p13 }
  0x35   : > { %781 = shalt.err (!%p778_p0)
}
  0x36   : > { %s782_s29 = scalar_lea.vmem %s1116_s15, 512  ;;  %s964_s26 = smov [#allocation2]  }
  0x37   : > { %p783_p10 = scmp.ne.s32.totalorder %s1116_s15, %s782_s29  ;;  %s787_s4 = sshll.u32 %s964_s26, 4  ;;  %s788_s4 = int_to_ptr.vmem [resolvable:$false] %s787_s4 }
  0x38   : > { %s789_s30 = scalar_lea.vmem %s788_s4, 1024  ;;  %p790_p5 = scmp.lt.s32.totalorder %s1116_s15, %s788_s4 }
  0x39   : > { %p785_p12 = pnand %p783_p10, %p769_p11  ;;  %p791_p1 = scmp.lt.s32.totalorder %s789_s30, %s782_s29 }
  0x3b   : > { %p786_p7 = pneg %p785_p12  ;;  %p792_p3 = por %p791_p1, %p790_p5 }
  0x3d   : > { %p793_p2 = pnand %p792_p3, %p786_p7 }
  0x3f   : > { %796 = shalt.err (!%p793_p2)
}
  0x40   : > { %s1324_s5 = smov 128   ;;  %s966_s7 = smov 8  }
  0x41   : > { %641 = dma.hbm_to_vmem [thread:$0]  (!%p1112_p8), %s1106_s21, 512, %s1116_s15, %s1118_s6, %s1324_s5, %s1324_s5, %s966_s7  }
  0x42   : > { %p584_p5 = scmp.ge.s32.totalorder %s962_s20, 1  ;;  %p190_p7 = scmp.lt.s32.totalorder %s962_s20, 3 }
  0x43   : > { %s76_s29 = sadd.s32 1, %s938_s14  ;;  %p83_p4 = scmp.ne.s32.totalorder %s938_s14, %s934_s13 }
  0x44   : > { %p1151_p0 = pnand %p584_p5, %p190_p7  ;;  %p89_p6 = scmp.ne.s32.totalorder %s934_s13, %s930_s12 }
  0x45   : > { %s1159_s26 = scalar_select %p1077_p9, %s938_s14, %s76_s29  }
  0x46   : > { %s166_s4 = sand.u32 1, %s938_s14   ;;  %s1339_s30 = sshll.u32 %s958_s19, 10 }
  0x47   : > { %s499_s17 = scalar_lea.hbm %s1314_s1, %s1339_s30  ;;  %p1340_p8 = scmp.eq.s32.totalorder %s962_s20, 0 }
  0x48   : > { %p1341_p13 = scmp.ne.s32.totalorder %s1330_s28, 0  ;;  %s580_s21 = sshll.u32 %s166_s4, 5 }
  0x49   : > { %p85_p11 = por %p83_p4, %p1340_p8  ;;  %s1179_s15 = scalar_lea.hbm %s499_s17, 512 }
  0x4a   : > { %p1175_p10 = por %p89_p6, %p1341_p13  ;;  %s170_s12 = scalar_lea.vmem [#allocation5], %s580_s21 }
  0x4b   : > { %s182_s8 = sshll.u32 %s170_s12, 4  ;;  %p1343_p9 = scmp.lt.s32.totalorder %s962_s20, 2  ;;  %s1187_s8 = int_to_ptr.vmem [resolvable:$true] %s182_s8 }
  0x4c   : > { %s1342_s6 = scalar_select %p1175_p10, 1, 0 }
  0x4d   : > { %p1183_p12 = pnand %p1343_p9, %p85_p11  ;;  %s1189_s0 = scalar_lea.sflag [#allocation6], %s166_s4 }
  0x4e   : > { %s827_s28 = scalar_lea.hbm %s499_s17, 1024  ;;  %s802_s21 = scalar_lea.hbm %s1314_s1, 2048 }
  0x4f   : > { %p798_p1 = scmp.ne.s32.totalorder %s1179_s15, %s827_s28  ;;  %p799_p3 = pneg %p1183_p12 }
  0x50   : > { %p803_p7 = scmp.lt.u32.totalorder %s1179_s15, %s1314_s1  ;;  %p804_p4 = scmp.lt.u32.totalorder %s802_s21, %s827_s28 }
  0x51   : > { %p800_p2 = pnand %p799_p3, %p798_p1  ;;  %p806_p8 = scmp.lt.u32.totalorder %s827_s28, %s1179_s15 }
  0x52   : > { %p805_p6 = por %p804_p4, %p803_p7 }
  0x53   : > { %p801_p5 = pneg %p800_p2 }
  0x54   : > { %p807_p11 = por %p806_p8, %p805_p6 }
  0x56   : > { %p808_p13 = pnand %p807_p11, %p801_p5 }
  0x58   : > { %811 = shalt.err (!%p808_p13)
}
  0x59   : > { %s812_s17 = scalar_lea.vmem %s1187_s8, 512  ;;  %s967_s4 = smov [#allocation5]  }
  0x5a   : > { %p813_p9 = scmp.ne.s32.totalorder %s1187_s8, %s812_s17  ;;  %s817_s30 = sshll.u32 %s967_s4, 4  ;;  %s818_s30 = int_to_ptr.vmem [resolvable:$false] %s817_s30 }
  0x5b   : > { %s819_s5 = scalar_lea.vmem %s818_s30, 1024  ;;  %p820_p10 = scmp.lt.s32.totalorder %s1187_s8, %s818_s30 }
  0x5c   : > { %p815_p1 = pnand %p813_p9, %p799_p3  ;;  %p821_p7 = scmp.lt.s32.totalorder %s819_s5, %s812_s17 }
  0x5e   : > { %p816_p2 = pneg %p815_p1  ;;  %p822_p4 = por %p821_p7, %p820_p10 }
  0x60   : > { %p823_p6 = pnand %p822_p4, %p816_p2 }
  0x62   : > { %826 = shalt.err (!%p823_p6)
}
  0x63   : > { %s1345_s28 = smov 128   ;;  %194 = sbr.rel (%p1151_p0) target bundleno = 366 (0x16e), region = 28 }
  0x64   : > { %644 = dma.hbm_to_vmem [thread:$0]  (!%p1183_p12), %s1179_s15, 512, %s1187_s8, %s1189_s0, %s1345_s28, %s1345_s28, %s966_s7  }
  0x65   : > { %s196_s23 = sand.u32 (!%p1151_p0), 1, %s946_s16   ;;  %p1346_p10 = scmp.ne.s32.totalorder (!%p1151_p0), %s1331_s3, 0 }
  0x66   : > { %s585_s21 = sshll.u32 (!%p1151_p0), %s196_s23, 5  ;;  %s197_s12 = scalar_lea.sflag (!%p1151_p0), [#allocation3], %s196_s23 }
  0x67   : > { %s200_s17 = scalar_lea.vmem (!%p1151_p0), [#allocation2], %s585_s21 }
  0x6a   : > { %905 = dma.done.wait (%p1346_p10), %s197_s12, 512  }
  0x6b   : > { %907 = vsyncadd (%p1346_p10), %s197_s12, 4294966784  ;;  %s205_s29 = sand.u32 1, %s934_s13   ;;  %p1347_p12 = scmp.ne.s32.totalorder %s1342_s6, 0 }
  0x6c   : > { %s586_s4 = sshll.u32 %s205_s29, 5  ;;  %s206_s30 = scalar_lea.sflag [#allocation6], %s205_s29 }
  0x6d   : > { %s209_s7 = scalar_lea.vmem [#allocation5], %s586_s4 }
  0x6e   : > { %909 = dma.done.wait (%p1347_p12), %s206_s30, 512  }
  0x6f   : > { %911 = vsyncadd (%p1347_p12), %s206_s30, 4294966784  ;;  %v249_v0 = vld [vmem:[%s209_s7] sm:$0xff]  ;;  %v250_v1 = vld [vmem:[%s209_s7 + $0x8] sm:$0xff]  ;;  %vm269_vm0 = vcmask 130048   ;;  %s232_s3 = sand.u32 1, %s922_s10   ;;  %s601_s8 = sshll.u32 %s954_s18, 9 }
  0x70   : > { %v251_v2 = vld [vmem:[%s209_s7 + $0x10] sm:$0xff]  ;;  %v253_v3 = vmul.f32 0.5, %v249_v0  ;;  %v254_v4 = vmul.f32 0.5, %v250_v1  ;;  %v252_v5 = vld [vmem:[%s209_s7 + $0x18] sm:$0xff]  ;;  %v241_v7 = vld [vmem:[%s200_s17] sm:$0xff]  ;;  %s587_s22 = sshll.u32 %s232_s3, 5  ;;  %s1243_s28 = scalar_lea.hbm %s1315_s2, %s601_s8 }
  0x71   : > { %v255_v6 = vmul.f32 0.5, %v251_v2  ;;  %v256_v8 = vmul.f32 0.5, %v252_v5  ;;  %751 = vtanh.f32 %v241_v7  ;;  %v243_v9 = vld [vmem:[%s200_s17 + $0x10] sm:$0xff]  ;;  %v242_v10 = vld [vmem:[%s200_s17 + $0x8] sm:$0xff]  ;;  %v244_v11 = vld [vmem:[%s200_s17 + $0x18] sm:$0xff]  ;;  %s234_s6 = scalar_lea.vmem [#allocation7], %s587_s22 }
  0x72   : > { %753 = vtanh.f32 %v253_v3  ;;  %s453_s15 = sshll.u32 %s234_s6, 4  ;;  %s1248_s18 = scalar_lea.sflag [#allocation4], %s232_s3  ;;  %s1238_s15 = int_to_ptr.vmem [resolvable:$true] %s453_s15 }
  0x73   : > { %755 = vtanh.f32 %v254_v4  ;;  %s828_s23 = scalar_lea.vmem %s1238_s15, 512  ;;  %p1348_p3 = scmp.ne.s32.totalorder %s1334_s27, 0 }
  0x74   : > { %757 = vtanh.f32 %v255_v6  ;;  %p829_p0 = scmp.ne.s32.totalorder %s1238_s15, %s828_s23  ;;  %s968_s21 = smov [#allocation7]  }
  0x75   : > { %759 = vtanh.f32 %v256_v8  ;;  %s832_s12 = sshll.u32 %s968_s21, 4  ;;  %s833_s12 = int_to_ptr.vmem [resolvable:$false] %s832_s12 }
  0x76   : > { %761 = vtanh.f32 %v243_v9  ;;  %p830_p5 = pnand %p829_p0, %p1348_p3  ;;  %s834_s17 = scalar_lea.vmem %s833_s12, 1024 }
  0x77   : > { %763 = vtanh.f32 %v242_v10  ;;  %p835_p11 = scmp.lt.s32.totalorder %s1238_s15, %s833_s12  ;;  %p836_p13 = scmp.lt.s32.totalorder %s834_s17, %s828_s23 }
  0x78   : > { %765 = vtanh.f32 %v244_v11  ;;  %p831_p8 = pneg %p830_p5 }
  0x79   : > { %p837_p9 = por %p836_p13, %p835_p11 }
  0x7b   : > { %v752_v12 = vpop.eup %751  ;;  %p838_p1 = pnand %p837_p9, %p831_p8 }
  0x7c   : > { %v754_v13 = vpop.eup %753  ;;  %614 = vmatprep.mubr.msk.f32.mxu0 %vm269_vm0, %v752_v12 }
  0x7d   : > { %v756_v14 = vpop.eup %755  ;;  %v261_v15 = vadd.f32 1.0, %v754_v13 }
  0x7e   : > { %v758_v16 = vpop.eup %757  ;;  %v262_v17 = vadd.f32 1.0, %v756_v14 }
  0x7f   : > { %v760_v18 = vpop.eup %759  ;;  %v265_v19 = vmul.f32 0.5, %v261_v15  ;;  %v263_v20 = vadd.f32 1.0, %v758_v16 }
  0x80   : > { %v762_v21 = vpop.eup %761  ;;  %v266_v22 = vmul.f32 0.5, %v262_v17  ;;  %v264_v23 = vadd.f32 1.0, %v760_v18 }
  0x81   : > { %v267_v24 = vmul.f32 0.5, %v263_v20  ;;  %621 = vmatprep.mubr.msk.f32.mxu1 %vm269_vm0, %v762_v21  ;;  %v764_v28 = vpop.eup %763 }
  0x82   : > { %v624_v25 = vpack.c.bf16 %v266_v22, %v265_v19  ;;  %v268_v26 = vmul.f32 0.5, %v264_v23  ;;  %v766_v29 = vpop.eup %765 }
  0x84   : > { %625 = vmatprep.subr.bf16.mxu0 %v624_v25  ;;  %v628_v27 = vpack.c.bf16 %v268_v26, %v267_v24 }
  0x85   : > { %627 = vmatpush3.bf16.msra.mxu0 %v624_v25 }
  0x86   : > { %629 = vmatprep.subr.bf16.mxu1 %v628_v27 }
  0x87   : > { %631 = vmatpush3.bf16.msra.mxu1 %v628_v27 }
  0x88   : > { %615 = vmatmul.mubr.msk.f32.vlgmr.msra.gmra.mrb[0].mxu0 %vm269_vm0, %v764_v28 }
  0x8a   : > { %622 = vmatmul.mubr.msk.f32.vlgmr.msra.gmra.mrb[0].mxu1 %vm269_vm0, %v766_v29 }
 0x15b   : > { %v616_v30 = vpop.f32.mrb[0].mxu0 }
 0x15c   : > { %433 = vst.msk [vmem:[%s234_s6 + $0x8] sm:$0xff] %vm269_vm0, %v616_v30  ;;  %v342_v31 = vpop.f32.mrb[1].mxu0 }
 0x15d   : > { %v623_v32 = vpop.f32.mrb[0].mxu1  ;;  %432 = vst.msk [vmem:[%s234_s6] sm:$0xff] %vm269_vm0, %v342_v31 }
 0x15e   : > { %435 = vst.msk [vmem:[%s234_s6 + $0x18] sm:$0xff] %vm269_vm0, %v623_v32  ;;  %v423_v33 = vpop.f32.mrb[1].mxu1 }
 0x15f   : > { %434 = vst.msk [vmem:[%s234_s6 + $0x10] sm:$0xff] %vm269_vm0, %v423_v33 }
 0x160   : > { %841 = shalt.err (!%p838_p1)
}
 0x161   : > { %s842_s29 = scalar_lea.hbm %s1243_s28, 512  ;;  %s846_s7 = scalar_lea.hbm %s1315_s2, 1024 }
 0x162   : > { %p843_p2 = scmp.ne.s32.totalorder %s1243_s28, %s842_s29  ;;  %p847_p6 = scmp.lt.u32.totalorder %s1243_s28, %s1315_s2 }
 0x163   : > { %p848_p10 = scmp.lt.u32.totalorder %s846_s7, %s842_s29  ;;  %p850_p0 = scmp.lt.u32.totalorder %s842_s29, %s1243_s28 }
 0x164   : > { %p844_p7 = pnand %p843_p2, %p1348_p3 }
 0x165   : > { %p849_p12 = por %p848_p10, %p847_p6 }
 0x166   : > { %p845_p4 = pneg %p844_p7 }
 0x167   : > { %p851_p5 = por %p850_p0, %p849_p12 }
 0x169   : > { %p852_p8 = pnand %p851_p5, %p845_p4 }
 0x16b   : > { %855 = shalt.err (!%p852_p8)
}
 0x16c   : > { %s969_s6 = smov 128   ;;  %s970_s8 = smov 8  }
 0x16d   : > { %636 = dma.vmem_to_hbm [thread:$0]  (%p1348_p3), %s1238_s15, 512, %s1243_s28, %s1248_s18, %s969_s6, %s969_s6, %s970_s8  }
 0x16e PF: > { %s468_s0 = sand.u32 1, %s918_s9   ;;  %p1349_p11 = scmp.ne.s32.totalorder %s1335_s25, 0 }
 0x16f   : > { %p1350_p13 = scmp.ge.s32.totalorder %s962_s20, 2  ;;  %s469_s5 = scalar_lea.sflag [#allocation4], %s468_s0 }
 0x171   : > { %p646_p9 = pnand %p1350_p13, %p1349_p11 }
 0x173   : > { %913 = dma.done.wait (!%p646_p9), %s469_s5, 512  }
 0x174   : > { %915 = vsyncadd (!%p646_p9), %s469_s5, 4294966784  ;;  %s21_s20 = sadd.s32 1, %s962_s20   ;;  %s1351_s27 = sld [smem:[#allocation11_spill]] }
 0x175   : > { %p18_p1 = scmp.ge.s32.totalorder %s21_s20, 4   ;;  %s1352_s17 = sld [smem:[#allocation13_spill]] }
 0x176   : > { %s1353_s28 = sld [smem:[#allocation12_spill]]  ;;  %s1354_s9 = smov %s922_s10 }
 0x177   : > { %s1355_s10 = smov %s926_s11  ;;  %s1356_s11 = smov %s1083_s24 }
 0x178   : > { %s1357_s12 = smov %s934_s13  ;;  %s1358_s13 = smov %s938_s14 }
 0x179   : > { %s1359_s14 = smov %s1159_s26  ;;  %s1360_s15 = smov %s946_s16 }
 0x17a   : > { %s1361_s16 = smov %s1351_s27  ;;  %s1362_s18 = smov %s958_s19 }
 0x17b   :  { %20 = sbr.rel (!%p18_p1) target bundleno = 13 (0xd), region = 86 }
 0x17c   : > { %s1363_s19 = smov %s1353_s28 }
 0x182   :  { %474 = vsyncpa [#allocation3], 1 }
 0x183   :  { %476 = vsyncpa [#allocation3 + $0x1], 1 }
 0x184   :  { %477 = vsyncpa [#allocation6], 1 }
 0x185   :  { %479 = vsyncpa [#allocation6 + $0x1], 1 }
 0x186   :  { %480 = vsyncpa [#allocation4], 1 }
 0x187   :  { %482 = vsyncpa [#allocation4 + $0x1], 1 }

</bundles_post_ra>
